<compile_context>
chip_gen: v6e
topology: v6e:2x2x1
jax: 0.10.0
libtpu: 0.0.40
codegen_flags: <defaults>
</compile_context>

<pallas_src>
import math

import jax
import jax.numpy as jnp
from jax.experimental import pallas as pl
from jax.experimental.pallas import tpu as pltpu


def _round_up(x, m):
    return (x + m - 1) // m * m


# ------------------------------------------------------------------ glue ops
def window2image(msa_output):
    """Identical to the PyTorch helper (dead code in forward, kept for parity)."""
    bs, num_window, num_patch_in_window, patch_depth = msa_output.shape
    window_size = int(math.sqrt(num_patch_in_window))
    n = int(math.sqrt(num_window))
    image_h = n * window_size
    x = msa_output.reshape(bs, n, n, window_size, window_size, patch_depth)
    x = jnp.swapaxes(x, 2, 3)
    x = x.reshape(bs, image_h * image_h, patch_depth)
    x = jnp.swapaxes(x, -1, -2).reshape(bs, patch_depth, image_h, image_h)
    return x


def unfold_nchw(x, m):
    """F.unfold(x, kernel=(m,m), stride=(m,m)).transpose(-1,-2) for NCHW x."""
    bs, c, h, w = x.shape
    oh, ow = h // m, w // m
    x = x.reshape(bs, c, oh, m, ow, m)
    # F.unfold channel ordering: (C, kh, kw), kw fastest; blocks indexed (oh, ow)
    x = x.transpose(0, 2, 4, 1, 3, 5)          # (bs, oh, ow, C, m, m)
    return x.reshape(bs, oh * ow, c * m * m)   # (bs, L, C*m*m)
    # TODO(synk): for large activations, fold this gather into the Pallas
    # input BlockSpec/index_map instead of materializing `merged` in HBM.


# ----------------------------------------------------------------- Pallas op
def _linear_kernel(x_ref, w_ref, b_ref, o_ref, acc_ref):
    k = pl.program_id(2)

    @pl.when(k == 0)
    def _init():
        acc_ref[...] = jnp.zeros_like(acc_ref)

    acc_ref[...] += jnp.dot(x_ref[...], w_ref[...],
                            preferred_element_type=jnp.float32)

    @pl.when(k == pl.num_programs(2) - 1)
    def _store():
        o_ref[...] = (acc_ref[...] + b_ref[...]).astype(o_ref.dtype)


def pallas_linear(x2d, w_t, b2d, *, out_dtype=jnp.float32):
    """y = x2d @ w_t + b2d.  x2d: (M, K) bf16, w_t: (K, Np) bf16, b2d: (1, Np) f32.

    Np must be a multiple of 128 (lane-dense output stores).
    """
    M, K = x2d.shape
    Kw, Np = w_t.shape
    assert Kw == K and b2d.shape == (1, Np)
    assert Np % 128 == 0, "pad out_features to a multiple of 128 in the caller"

    # --- tile selection ------------------------------------------------------
    # M: one big row tile for small problems (single grid step), else the
    # largest multiple of 8 <= 1024 that divides M.
    if M <= 1024 or M % 8 != 0:
        tm = M
    else:
        tm = 1024
        while M % tm != 0:
            tm -= 8
    # N: lane-dense tiles, at most 512 wide.
    tn = Np if Np <= 512 else 512
    while Np % tn != 0:
        tn -= 128
    # K: keep whole unless large; large K is accumulated in 512-wide slices.
    if K <= 2048:
        tk = K
    else:
        tk = 512
        while tk > 128 and K % tk != 0:
            tk -= 128
        if K % tk != 0:
            tk = K
    assert M % tm == 0 and Np % tn == 0 and K % tk == 0

    grid = (M // tm, Np // tn, K // tk)

    # --- VMEM budget (double-buffered inputs/output + accumulator, headroom) --
    bytes_x = tm * tk * x2d.dtype.itemsize
    bytes_w = tk * tn * w_t.dtype.itemsize
    bytes_b = tn * b2d.dtype.itemsize
    bytes_o = tm * tn * 4
    bytes_acc = tm * tn * 4
    vmem_est = 2 * (bytes_x + bytes_w + bytes_b + bytes_o) + bytes_acc
    vmem_limit = min(max(int(vmem_est * 1.5) + (4 << 20), 16 << 20), 64 << 20)

    cost = pl.CostEstimate(
        flops=2 * M * K * Np,
        bytes_accessed=(M * K * x2d.dtype.itemsize
                        + K * Np * w_t.dtype.itemsize
                        + Np * b2d.dtype.itemsize
                        + M * Np * 4),
        transcendentals=0,
    )

    return pl.pallas_call(
        _linear_kernel,
        out_shape=jax.ShapeDtypeStruct((M, Np), out_dtype),
        grid_spec=pltpu.PrefetchScalarGridSpec(
            num_scalar_prefetch=0,
            grid=grid,
            in_specs=[
                pl.BlockSpec((tm, tk), lambda i, j, k: (i, k)),
                pl.BlockSpec((tk, tn), lambda i, j, k: (k, j)),
                pl.BlockSpec((1, tn), lambda i, j, k: (0, j)),
            ],
            out_specs=pl.BlockSpec((tm, tn), lambda i, j, k: (i, j)),
            scratch_shapes=[pltpu.VMEM((tm, tn), jnp.float32)],
        ),
        compiler_params=pltpu.CompilerParams(
            dimension_semantics=("parallel", "parallel", "arbitrary"),
            vmem_limit_bytes=vmem_limit,
        ),
        cost_estimate=cost,
    )(x2d, w_t, b2d)


# --------------------------------------------------------------- the module
class PatchMerging:
    def __init__(self, model_dim, merge_size, output_depth_scale=0.5, *, key):
        self.merge_size = merge_size
        in_features = model_dim * merge_size * merge_size
        out_features = int(model_dim * merge_size * merge_size * output_depth_scale)
        self.in_features = in_features
        self.out_features = out_features

        k_w, k_b = jax.random.split(key)
        bound = 1.0 / math.sqrt(in_features)
        # Deterministic nn.Linear-style uniform init (weight stored (out, in)).
        self.weight = jax.random.uniform(
            k_w, (out_features, in_features), jnp.float32, -bound, bound)
        self.bias = jax.random.uniform(
            k_b, (out_features,), jnp.float32, -bound, bound)

        # Kernel-side constants prepared once: pre-transposed, 128-padded
        # columns (lane-dense stores), weight in bf16 for the MXU.
        n_pad = _round_up(max(out_features, 1), 128)
        w_t = jnp.zeros((in_features, n_pad), jnp.float32)
        w_t = w_t.at[:, :out_features].set(self.weight.T)
        self.w_t_bf16 = w_t.astype(jnp.bfloat16)
        self.b_pad = jnp.zeros((1, n_pad), jnp.float32).at[:, :out_features].set(self.bias)
        self.n_pad = n_pad

    def __call__(self, x):
        bs, num_window, num_patch_in_window, patch_depth = x.shape
        # The reference forward feeds the raw 4-D tensor to F.unfold (its
        # window2image result is discarded via a typo), so the unfolded
        # channel count num_window*m*m must equal the Linear's in_features.
        assert num_window * self.merge_size ** 2 == self.in_features, (
            "PatchMerging (as specified) requires num_window == model_dim")

        _ = window2image(x)  # mirrors original: result unused (`iuput` typo)

        merged = unfold_nchw(x, self.merge_size)          # (bs, L, num_window*m*m)
        L, K = merged.shape[1], merged.shape[2]
        x2d = merged.reshape(bs * L, K).astype(jnp.bfloat16)
        y = pallas_linear(x2d, self.w_t_bf16, self.b_pad)  # (bs*L, n_pad) f32
        y = y[:, : self.out_features]
        return y.reshape(bs, L, self.out_features)


# -------------------------------------------------------------------- main
if __name__ == "__main__":
    bs = 2
    model_dim = 4
    merge_size = 2
    num_window = model_dim            # required by the module's (buggy) unfold path
    num_patch_in_window = 16          # window_size = 4
    patch_depth = 16

    key = jax.random.PRNGKey(0)
    k_x, k_p = jax.random.split(key)
    x = jax.random.normal(
        k_x, (bs, num_window, num_patch_in_window, patch_depth), jnp.float32)

    module = PatchMerging(model_dim, merge_size, key=k_p)
    out = jax.block_until_ready(module(x))

    # pure-JAX reference with the same numerics budget (bf16 in, f32 accumulate)
    merged_ref = unfold_nchw(x, merge_size)
    ref = jnp.einsum(
        "blk,nk->bln",
        merged_ref.astype(jnp.bfloat16),
        module.weight.astype(jnp.bfloat16),
        preferred_element_type=jnp.float32,
    ) + module.bias
    assert out.shape == ref.shape, (out.shape, ref.shape)
    assert jnp.allclose(out, ref, atol=2e-3, rtol=2e-3), float(jnp.max(jnp.abs(out - ref)))

    print("KERNEL_OK")
</pallas_src>

<mosaic_0001>
module attributes {stable_mosaic.version = 11 : i64} {
  func.func @_linear_kernel(%arg0: i32, %arg1: i32, %arg2: i32, %arg3: memref<128x16xbf16, #tpu.memory_space<vmem>>, %arg4: memref<16x128xbf16, #tpu.memory_space<vmem>>, %arg5: memref<1x128xf32, #tpu.memory_space<vmem>>, %arg6: memref<128x128xf32, #tpu.memory_space<vmem>>, %arg7: memref<128x128xf32, #tpu.memory_space<vmem>>) attributes {dimension_semantics = [#tpu.dimension_semantics<parallel>, #tpu.dimension_semantics<parallel>, #tpu.dimension_semantics<arbitrary>], iteration_bounds = array<i64: 1, 1, 1>, scalar_prefetch = 0 : i64, scratch_operands = 1 : i64, tpu.core_type = #tpu.core_type<tc>, window_params = [{transform_indices = @transform_0, window_bounds = array<i64: 128, 16>}, {transform_indices = @transform_1, window_bounds = array<i64: 16, 128>}, {transform_indices = @transform_2, window_bounds = array<i64: 1, 128>}, {transform_indices = @transform_3, window_bounds = array<i64: 128, 128>}]} {
    %c0_i32 = arith.constant 0 : i32
    %0 = arith.cmpi eq, %arg2, %c0_i32 : i32
    %1 = arith.extui %0 : i1 to i32
    %c0_i32_0 = arith.constant 0 : i32
    %2 = arith.cmpi ne, %1, %c0_i32_0 : i32
    scf.if %2 {
      %cst_10 = arith.constant 0.000000e+00 : f32
      %12 = vector.broadcast %cst_10 : f32 to vector<128x128xf32>
      %c0_11 = arith.constant 0 : index
      %c0_12 = arith.constant 0 : index
      %13 = vector.load %arg7[%c0_11, %c0_12] : memref<128x128xf32, #tpu.memory_space<vmem>>, vector<128x128xf32>
      tpu.vector_store %arg7[%c0_11, %c0_12], %12 {strides = array<i32>} : memref<128x128xf32, #tpu.memory_space<vmem>>, vector<128x128xf32>,
    } else {
    }
    %c0 = arith.constant 0 : index
    %c0_1 = arith.constant 0 : index
    %3 = vector.load %arg7[%c0, %c0_1] : memref<128x128xf32, #tpu.memory_space<vmem>>, vector<128x128xf32>
    %c0_2 = arith.constant 0 : index
    %c0_3 = arith.constant 0 : index
    %4 = vector.load %arg3[%c0_2, %c0_3] : memref<128x16xbf16, #tpu.memory_space<vmem>>, vector<128x16xbf16>
    %c0_4 = arith.constant 0 : index
    %c0_5 = arith.constant 0 : index
    %5 = vector.load %arg4[%c0_4, %c0_5] : memref<16x128xbf16, #tpu.memory_space<vmem>>, vector<16x128xbf16>
    %cst = arith.constant dense<0.000000e+00> : vector<128x128xf32>
    %6 = tpu.matmul %4, %5, %cst {dimension_numbers = #tpu.dot_dimension_numbers<[1], [0], [0], [1], [0, 0, 1, 1], [], []>} : vector<128x16xbf16>, vector<16x128xbf16>, vector<128x128xf32> -> vector<128x128xf32>
    %7 = arith.addf %3, %6 : vector<128x128xf32>
    %c0_6 = arith.constant 0 : index
    %c0_7 = arith.constant 0 : index
    %8 = vector.load %arg7[%c0_6, %c0_7] : memref<128x128xf32, #tpu.memory_space<vmem>>, vector<128x128xf32>
    tpu.vector_store %arg7[%c0_6, %c0_7], %7 {strides = array<i32>} : memref<128x128xf32, #tpu.memory_space<vmem>>, vector<128x128xf32>,
    %c0_i32_8 = arith.constant 0 : i32
    %9 = arith.cmpi eq, %arg2, %c0_i32_8 : i32
    %10 = arith.extui %9 : i1 to i32
    %c0_i32_9 = arith.constant 0 : i32
    %11 = arith.cmpi ne, %10, %c0_i32_9 : i32
    scf.if %11 {
      %c0_10 = arith.constant 0 : index
      %c0_11 = arith.constant 0 : index
      %12 = vector.load %arg7[%c0_10, %c0_11] : memref<128x128xf32, #tpu.memory_space<vmem>>, vector<128x128xf32>
      %c0_12 = arith.constant 0 : index
      %c0_13 = arith.constant 0 : index
      %13 = vector.load %arg5[%c0_12, %c0_13] : memref<1x128xf32, #tpu.memory_space<vmem>>, vector<1x128xf32>
      %14 = vector.broadcast %13 : vector<1x128xf32> to vector<128x128xf32>
      %15 = arith.addf %12, %14 : vector<128x128xf32>
      %c0_14 = arith.constant 0 : index
      %c0_15 = arith.constant 0 : index
      %16 = vector.load %arg6[%c0_14, %c0_15] : memref<128x128xf32, #tpu.memory_space<vmem>>, vector<128x128xf32>
      tpu.vector_store %arg6[%c0_14, %c0_15], %15 {strides = array<i32>} : memref<128x128xf32, #tpu.memory_space<vmem>>, vector<128x128xf32>,
    } else {
    }
    return
  }
  func.func @transform_0(%arg0: i32, %arg1: i32, %arg2: i32) -> (i32, i32) {
    %c0_i32 = arith.constant 0 : i32
    return %arg0, %arg2 : i32, i32
  }
  func.func @transform_1(%arg0: i32, %arg1: i32, %arg2: i32) -> (i32, i32) {
    %c0_i32 = arith.constant 0 : i32
    return %arg2, %arg1 : i32, i32
  }
  func.func @transform_2(%arg0: i32, %arg1: i32, %arg2: i32) -> (i32, i32) {
    %c0_i32 = arith.constant 0 : i32
    %c0_i32_0 = arith.constant 0 : i32
    return %c0_i32, %arg1 : i32, i32
  }
  func.func @transform_3(%arg0: i32, %arg1: i32, %arg2: i32) -> (i32, i32) {
    %c0_i32 = arith.constant 0 : i32
    return %arg0, %arg1 : i32, i32
  }
}

</mosaic_0001>

<bundles_post_ra>
// kernel: tpu_custom_call.1
= control target key start
LH: loop header
LB: loop body
LE: loop exit
PB: predicated region body
PF: predicated region fallthrough
CT: control target
= control target key end

     0   :  { %vm116_vm0 = vcmask 130048   ;;  %s489_s0 = inlined_call_operand.vmem [shape: bf16[128,16], index: 0, kind: input, shape index: {}]   ;;  %s490_s1 = inlined_call_operand.vmem [shape: bf16[16,128], index: 1, kind: input, shape index: {}]   ;;  %s491_s2 = inlined_call_operand.vmem [shape: f32[1,128], index: 2, kind: input, shape index: {}]   ;;  %s492_s3 = inlined_call_operand.hbm [shape: f32[128,128], index: 3, kind: output, shape index: {}]  }
   0x1   :  { %v394_v0 = vld [vmem:[%s490_s1] sm:$0xff]   ;;  %v397_v3 = vld [vmem:[%s489_s0 + $0x8] sm:$0xff]   ;;  %v399_v5 = vld [vmem:[%s489_s0 + $0x10] sm:$0xff]  }
   0x2   :  { %v395_v1 = vld [vmem:[%s489_s0] sm:$0xff]   ;;  %371 = vmatprep.subr.bf16.mxu0 %v394_v0  ;;  %389 = vmatprep.subr.bf16.mxu1 %v394_v0  ;;  %v398_v4 = vld [vmem:[%s489_s0 + $0x28] sm:$0xff]   ;;  %v400_v6 = vld [vmem:[%s489_s0 + $0x30] sm:$0xff]  }
   0x3   :  { %v396_v2 = vld [vmem:[%s489_s0 + $0x20] sm:$0xff]   ;;  %372 = vmatpush3.bf16.msra.mxu0 %v394_v0  ;;  %390 = vmatpush3.bf16.msra.mxu1 %v394_v0 }
   0x4   :  { %373 = vmatprep.mubr.msk.bf16.mxu0 %vm116_vm0, %v395_v1  ;;  %381 = vmatprep.mubr.msk.bf16.mxu1 %vm116_vm0, %v396_v2 }
   0x6   :  { %374 = vmatmul.mubr.msk.bf16.vlgmr.msra.gmra.mxu0 %vm116_vm0, %v397_v3  ;;  %382 = vmatmul.mubr.msk.bf16.vlgmr.msra.gmra.mxu1 %vm116_vm0, %v398_v4 }
   0x7   :  { %377 = vmatprep.mubr.msk.bf16.mxu0 %vm116_vm0, %v399_v5  ;;  %385 = vmatprep.mubr.msk.bf16.mxu1 %vm116_vm0, %v400_v6 }
   0x8   :  { %8 = vsyncpa [#allocation4], 0  ;;  %v401_v7 = vld [vmem:[%s489_s0 + $0x18] sm:$0xff]   ;;  %v361_v9 = vld [vmem:[%s491_s2] ss:$0 sm:$0xff] }
   0x9   :  { %v402_v8 = vld [vmem:[%s489_s0 + $0x38] sm:$0xff]   ;;  %s425_s0 = smov [#allocation3]  }
   0xa   :  { %s333_s2 = sshll.u32 %s425_s0, 4  ;;  %s334_s2 = int_to_ptr.vmem [resolvable:$true] %s333_s2 }
   0xb   :  { %s403_s4 = scalar_lea.vmem %s334_s2, 2048  ;;  %p408_p1 = scmp.lt.s32.totalorder %s334_s2, %s334_s2 }
   0xc   :  { %p404_p0 = scmp.ne.s32.totalorder %s334_s2, %s403_s4  ;;  %p409_p2 = scmp.lt.s32.totalorder %s403_s4, %s403_s4 }
   0xe   :  { %378 = vmatmul.mubr.msk.bf16.gmra.mxu0 %vm116_vm0, %v401_v7  ;;  %386 = vmatmul.mubr.msk.bf16.gmra.mxu1 %vm116_vm0, %v402_v8  ;;  %p410_p3 = por %p409_p2, %p408_p1 }
  0x10   :  { %p411_p4 = pnand %p410_p3, %p404_p0 }
  0xc6   :  { %v375_v10 = vpop.f32.mrf.mxu0  ;;  %v383_v11 = vpop.f32.mrf.mxu1 }
  0xc7   :  { %v298_v12 = vadd.f32 %v375_v10, %v361_v9  ;;  %v306_v13 = vadd.f32 %v383_v11, %v361_v9 }
  0xc8   :  { %v175_v14 = vpop.f32.mrf.mxu0  ;;  %v207_v15 = vpop.f32.mrf.mxu1 }
  0xc9   :  { %314 = vst [vmem:[#allocation3 + $0x10] sm:$0xff] %v298_v12  ;;  %322 = vst [vmem:[#allocation3 + $0x50] sm:$0xff] %v306_v13  ;;  %v296_v16 = vadd.f32 %v361_v9, %v175_v14  ;;  %v304_v17 = vadd.f32 %v361_v9, %v207_v15 }
  0xca   :  { %v376_v18 = vpop.f32.mrf.mxu0  ;;  %v384_v19 = vpop.f32.mrf.mxu1 }
  0xcb   :  { %312 = vst [vmem:[#allocation3] sm:$0xff] %v296_v16  ;;  %320 = vst [vmem:[#allocation3 + $0x40] sm:$0xff] %v304_v17  ;;  %v299_v20 = vadd.f32 %v376_v18, %v361_v9  ;;  %v307_v21 = vadd.f32 %v384_v19, %v361_v9 }
  0xcc   :  { %v178_v22 = vpop.f32.mrf.mxu0  ;;  %v210_v23 = vpop.f32.mrf.mxu1 }
  0xcd   :  { %315 = vst [vmem:[#allocation3 + $0x18] sm:$0xff] %v299_v20  ;;  %323 = vst [vmem:[#allocation3 + $0x58] sm:$0xff] %v307_v21  ;;  %v297_v24 = vadd.f32 %v361_v9, %v178_v22  ;;  %v305_v25 = vadd.f32 %v361_v9, %v210_v23 }
  0xce   :  { %v379_v26 = vpop.f32.mrf.mxu0  ;;  %v387_v27 = vpop.f32.mrf.mxu1 }
  0xcf   :  { %313 = vst [vmem:[#allocation3 + $0x8] sm:$0xff] %v297_v24  ;;  %321 = vst [vmem:[#allocation3 + $0x48] sm:$0xff] %v305_v25  ;;  %v302_v28 = vadd.f32 %v379_v26, %v361_v9  ;;  %v310_v29 = vadd.f32 %v387_v27, %v361_v9 }
  0xd0   :  { %v191_v30 = vpop.f32.mrf.mxu0  ;;  %v223_v31 = vpop.f32.mrf.mxu1 }
  0xd1   :  { %318 = vst [vmem:[#allocation3 + $0x30] sm:$0xff] %v302_v28  ;;  %326 = vst [vmem:[#allocation3 + $0x70] sm:$0xff] %v310_v29  ;;  %v300_v32 = vadd.f32 %v361_v9, %v191_v30  ;;  %v308_v33 = vadd.f32 %v361_v9, %v223_v31 }
  0xd2   :  { %v380_v34 = vpop.f32.mrf.mxu0  ;;  %v388_v35 = vpop.f32.mrf.mxu1 }
  0xd3   :  { %316 = vst [vmem:[#allocation3 + $0x20] sm:$0xff] %v300_v32  ;;  %324 = vst [vmem:[#allocation3 + $0x60] sm:$0xff] %v308_v33  ;;  %v303_v36 = vadd.f32 %v380_v34, %v361_v9  ;;  %v311_v37 = vadd.f32 %v388_v35, %v361_v9 }
  0xd4   :  { %v194_v38 = vpop.f32.mrf.mxu0  ;;  %v226_v39 = vpop.f32.mrf.mxu1 }
  0xd5   :  { %319 = vst [vmem:[#allocation3 + $0x38] sm:$0xff] %v303_v36  ;;  %327 = vst [vmem:[#allocation3 + $0x78] sm:$0xff] %v311_v37  ;;  %v301_v40 = vadd.f32 %v361_v9, %v194_v38  ;;  %v309_v41 = vadd.f32 %v361_v9, %v226_v39 }
  0xd7   :  { %317 = vst [vmem:[#allocation3 + $0x28] sm:$0xff] %v301_v40  ;;  %325 = vst [vmem:[#allocation3 + $0x68] sm:$0xff] %v309_v41 }
  0xd8   :  { %414 = shalt.err (!%p411_p4)
}
  0xd9   :  { %s426_s5 = smov 128   ;;  %s427_s6 = smov 8  }
  0xda   :  { %339 = dma.vmem_to_hbm [thread:$0]  %s334_s2, 2048, %s492_s3, [#allocation4], %s426_s5, %s426_s5, %s427_s6  }
  0xdb   :  { %423 = dma.done.wait [#allocation4], 2048  }
  0xdc   :  { %424 = vsyncadd [#allocation4], 4294965248 }
  0xdd   :  { %343 = vsyncpa [#allocation4], 1 }

</bundles_post_ra>
